<compile_context>
chip_gen: v7x
topology: tpu7x:2x2x1
jax: 0.10.0
libtpu: 0.0.40
codegen_flags: <defaults>
</compile_context>

<pallas_src>
import functools

import jax
import jax.numpy as jnp
from jax.experimental import pallas as pl
from jax.experimental.pallas import tpu as pltpu

EPS = 1e-5  # nn.BatchNorm1d default eps


def _round_up(a: int, b: int) -> int:
    return (a + b - 1) // b * b


def _cdiv(a: int, b: int) -> int:
    return (a + b - 1) // b


# --------------------------------------------------------------------------- #
# Kernel 1: scatter-add pooling (one-hot matmul), per-core partial sums.       #
# --------------------------------------------------------------------------- #
def _pool_kernel(batch_ref, x_ref, part_ref, *, n_valid, tile_rows,
                 tiles_per_core, chunk, g_pad, mask_rows):
    # batch_ref : [1, TN]       int32  graph id per node (wrapper pad -> g_pad)
    # x_ref     : [TN, H]       node features (native dtype, streamed from HBM)
    # part_ref  : [G_pad, H]    f32    per-core partial pooled sums (resident block)
    t = pl.program_id(1)
    step = pl.program_id(0) * tiles_per_core + t     # logical node-tile index

    @pl.when(t == 0)
    def _init():
        part_ref[...] = jnp.zeros_like(part_ref)

    h = x_ref.shape[1]
    n_chunks = tile_rows // chunk
    # Graph-id iota is chunk-invariant: computed once per tile, outside the loop.
    graph_ids = jax.lax.broadcasted_iota(jnp.int32, (g_pad, chunk), 0)
    row_base = step * tile_rows

    def one_chunk(ids, xc, base):
        # ids: [1, chunk] int32, xc: [chunk, H]
        if mask_rows:
            offs = jax.lax.broadcasted_iota(jnp.int32, (chunk, 1), 0)
            valid = (base + offs) < n_valid
            xc = jnp.where(valid, xc, jnp.zeros_like(xc))   # select: kills garbage/NaN
        onehot = (graph_ids == ids).astype(xc.dtype)        # exact 0/1
        return jnp.dot(onehot, xc, preferred_element_type=jnp.float32)

    if n_chunks == 1:
        acc = one_chunk(batch_ref[...], x_ref[...], row_base)
    else:
        def body(i, acc):
            start = pl.multiple_of(i * chunk, chunk)
            return acc + one_chunk(batch_ref[:, pl.ds(start, chunk)],
                                   x_ref[pl.ds(start, chunk), :],
                                   row_base + start)
        acc = jax.lax.fori_loop(0, n_chunks, body,
                                jnp.zeros((g_pad, h), jnp.float32), unroll=True)

    part_ref[...] += acc


# --------------------------------------------------------------------------- #
# Kernel 2: tiny epilogue -- combine per-core partials + BN-folded 2-layer MLP #
# --------------------------------------------------------------------------- #
def _mlp_kernel(part_ref, w0t_ref, b0_ref, w1t_ref, b1_ref, out_ref):
    # part_ref: [P, G_pad, H] f32 per-core partial pooled sums
    pooled = jnp.sum(part_ref[...], axis=0)                  # keep f32 (no bf16 rounding)
    hmid = jnp.dot(pooled, w0t_ref[...],
                   preferred_element_type=jnp.float32) + b0_ref[...]
    hmid = jnp.maximum(hmid, 0.0)                            # ReLU (BN folded into W0/b0)
    out_ref[...] = (jnp.dot(hmid, w1t_ref[...],
                            preferred_element_type=jnp.float32)
                    + b1_ref[...]).astype(out_ref.dtype)     # lane-dense store


def gnn1_forward(x, batch, num_graphs, params, *, tile_n=8192, chunk_n=512,
                 num_cores=2):
    """GNN1.forward (pooling='add', dos_bins=0).

    x: [N, nhid] node features (additional_x), batch: [N] int graph assignment.
    """
    N, H = x.shape
    nout = params["w1"].shape[0]
    x_isz = int(x.dtype.itemsize)
    G_pad = _round_up(max(int(num_graphs), 1), 8)

    # ---- node-dimension tiling (x is streamed un-padded, in its native dtype) ----
    chunk_n = max(128, _round_up(int(chunk_n), 128))
    tile_n = max(chunk_n, _round_up(int(tile_n), chunk_n))
    # keep the double-buffered x tile within ~32 MiB (fits v5e/v6e/v7x scoped VMEM)
    max_rows = max(chunk_n, ((32 << 20) // max(1, 2 * H * x_isz)) // chunk_n * chunk_n)
    tile_n = min(tile_n, max_rows)

    if N <= tile_n:
        TN, num_tiles, chunk = N, 1, N        # whole-array block, nothing padded/masked
    else:
        TN, chunk = tile_n, chunk_n
        num_tiles = _cdiv(N, TN)

    P = max(1, min(int(num_cores), num_tiles))  # v7x: 2-TC split; others run it serially
    Tpc = _cdiv(num_tiles, P)
    total_tiles = P * Tpc
    mask_rows = (total_tiles * TN != N)

    # ---- batch ids: tiny array; pad with an out-of-range graph id ----
    batch2d = batch.reshape(1, N).astype(jnp.int32)
    if total_tiles * TN > N:
        batch2d = jnp.pad(batch2d, ((0, 0), (0, total_tiles * TN - N)),
                          constant_values=G_pad)

    if total_tiles == num_tiles:
        x_map = lambda p, t: (p * Tpc + t, 0)
    else:
        # clamp "extra" tiles onto the last real tile; their rows are masked to 0
        x_map = lambda p, t: (jnp.minimum(p * Tpc + t, num_tiles - 1), 0)
    batch_map = lambda p, t: (0, p * Tpc + t)

    kernel = functools.partial(
        _pool_kernel, n_valid=N, tile_rows=TN, tiles_per_core=Tpc,
        chunk=chunk, g_pad=G_pad, mask_rows=mask_rows)

    need = (2 * TN * H * x_isz + 2 * TN * 4 + 4 * G_pad * H * 4
            + 2 * G_pad * chunk * 4 + (4 << 20))
    vmem_limit = int(min(max(need, 32 << 20), 56 << 20))

    cost = pl.CostEstimate(
        flops=int(2 * G_pad * total_tiles * TN * H),
        transcendentals=0,
        bytes_accessed=int(N * H * x_isz + total_tiles * TN * 4 + P * G_pad * H * 4),
    )

    partials = pl.pallas_call(
        kernel,
        out_shape=jax.ShapeDtypeStruct((P, G_pad, H), jnp.float32),
        grid_spec=pltpu.PrefetchScalarGridSpec(
            num_scalar_prefetch=0,
            grid=(P, Tpc),
            in_specs=[
                pl.BlockSpec((1, TN), batch_map),        # graph ids (tiny stream)
                pl.BlockSpec((TN, H), x_map),            # node features (dominant stream)
            ],
            out_specs=pl.BlockSpec((None, G_pad, H), lambda p, t: (p, 0, 0)),
        ),
        compiler_params=pltpu.CompilerParams(
            dimension_semantics=("parallel", "arbitrary"),
            vmem_limit_bytes=vmem_limit,
        ),
        cost_estimate=cost,
    )(batch2d, x)

    # ---- fold eval-mode BatchNorm1d into layer-0 Linear (tiny, done once) ----
    scale = params["bn_gamma"] * jax.lax.rsqrt(params["bn_var"] + EPS)          # [H]
    w0t = (params["w0"].T * scale[None, :]).astype(jnp.float32)                  # [H, H]
    b0 = (params["bn_beta"] - params["bn_mean"] * scale).reshape(1, H)
    b0 = b0.astype(jnp.float32)
    NOUT_pad = _round_up(nout, 128)                                              # lane-dense store
    w1t = jnp.zeros((H, NOUT_pad), jnp.float32).at[:, :nout].set(
        params["w1"].T.astype(jnp.float32))
    b1 = jnp.zeros((1, NOUT_pad), jnp.float32).at[0, :nout].set(params["b1"])

    out_padded = pl.pallas_call(
        _mlp_kernel,
        out_shape=jax.ShapeDtypeStruct((G_pad, NOUT_pad), jnp.float32),
    )(partials, w0t, b0, w1t, b1)

    return out_padded[:num_graphs, :nout]


def gnn1_reference(x, batch, num_graphs, params):
    """Pure-JAX reference mirroring the PyTorch forward (pooling='add', dos_bins=0)."""
    pooled = jax.ops.segment_sum(x, batch, num_segments=num_graphs)
    h = pooled @ params["w0"].T
    h = (h - params["bn_mean"]) / jnp.sqrt(params["bn_var"] + EPS) \
        * params["bn_gamma"] + params["bn_beta"]
    h = jnp.maximum(h, 0.0)
    return h @ params["w1"].T + params["b1"]


if __name__ == "__main__":
    key = jax.random.PRNGKey(0)
    H, NOUT = 32, 8                      # nhid, nout
    kp = jax.random.split(key, 8)

    params = dict(
        # output_encoder = MLP(nhid, nout, nlayer=2, with_final_activation=False, with_norm=True)
        w0=jax.random.normal(kp[0], (H, H), jnp.float32) / jnp.sqrt(H),     # Linear(nhid, nhid, bias=False)
        bn_gamma=jnp.ones((H,), jnp.float32),                               # BatchNorm1d(nhid) defaults
        bn_beta=jnp.zeros((H,), jnp.float32),
        bn_mean=jnp.zeros((H,), jnp.float32),
        bn_var=jnp.ones((H,), jnp.float32),
        w1=jax.random.normal(kp[1], (NOUT, H), jnp.float32) / jnp.sqrt(H),  # Linear(nhid, nout, bias=True)
        b1=0.01 * jax.random.normal(kp[2], (NOUT,), jnp.float32),
    )

    def check(N, G, kx, kb, tol, **kw):
        x = jax.random.normal(kx, (N, H), jnp.float32)                      # additional_x
        batch = jnp.sort(jax.random.randint(kb, (N,), 0, G)).astype(jnp.int32)
        ref = gnn1_reference(x, batch, G, params)
        out = jax.block_until_ready(gnn1_forward(x, batch, G, params, **kw))
        assert out.shape == (G, NOUT), out.shape
        err = float(jnp.max(jnp.abs(out - ref)))
        assert jnp.allclose(out, ref, atol=tol, rtol=tol), err

    # 1) default config path: tiny graph batch, single node tile, nothing padded
    check(64, 4, kp[3], kp[4], 1e-3)
    # 2) multi-tile + 2-core split + ragged tail + in-kernel K-chunking
    check(850, 5, kp[5], kp[6], 1e-2, tile_n=256, chunk_n=128, num_cores=2)
    # 3) uneven tiles-per-core (clamped "extra" tile, masked to zero contribution)
    check(800, 6, kp[7], kp[4], 1e-2, tile_n=128, chunk_n=128, num_cores=2)

    print("KERNEL_OK")
</pallas_src>

<mosaic_0001>
module attributes {stable_mosaic.version = 11 : i64} {
  func.func @_pool_kernel(%arg0: i32, %arg1: i32, %arg2: memref<1x64xi32, #tpu.memory_space<vmem>>, %arg3: memref<64x32xf32, #tpu.memory_space<vmem>>, %arg4: memref<1x8x32xf32, #tpu.memory_space<vmem>>) attributes {dimension_semantics = [#tpu.dimension_semantics<parallel>, #tpu.dimension_semantics<arbitrary>], iteration_bounds = array<i64: 1, 1>, scalar_prefetch = 0 : i64, scratch_operands = 0 : i64, tpu.core_type = #tpu.core_type<tc>, window_params = [{transform_indices = @transform_0, window_bounds = array<i64: 1, 64>}, {transform_indices = @transform_1, window_bounds = array<i64: 64, 32>}, {transform_indices = @transform_2, window_bounds = array<i64: 1, 8, 32>}]} {
    %c0_i32 = arith.constant 0 : i32
    %0 = arith.cmpi eq, %arg1, %c0_i32 : i32
    %1 = arith.extui %0 : i1 to i32
    %c0_i32_0 = arith.constant 0 : i32
    %2 = arith.cmpi ne, %1, %c0_i32_0 : i32
    scf.if %2 {
      %cst_10 = arith.constant 0.000000e+00 : f32
      %17 = vector.broadcast %cst_10 : f32 to vector<8x32xf32>
      %c0_11 = arith.constant 0 : index
      %c0_12 = arith.constant 0 : index
      %c0_13 = arith.constant 0 : index
      %18 = vector.load %arg4[%c0_11, %c0_12, %c0_13] : memref<1x8x32xf32, #tpu.memory_space<vmem>>, vector<1x8x32xf32>
      %19 = vector.shape_cast %18 : vector<1x8x32xf32> to vector<8x32xf32>
      %20 = vector.shape_cast %17 : vector<8x32xf32> to vector<1x8x32xf32>
      tpu.vector_store %arg4[%c0_11, %c0_12, %c0_13], %20 {strides = array<i32>} : memref<1x8x32xf32, #tpu.memory_space<vmem>>, vector<1x8x32xf32>,
    } else {
    }
    %3 = tpu.iota {dimensions = array<i32: 0>} : vector<8x64xi32>
    %c0 = arith.constant 0 : index
    %c0_1 = arith.constant 0 : index
    %4 = vector.load %arg2[%c0, %c0_1] : memref<1x64xi32, #tpu.memory_space<vmem>>, vector<1x64xi32>
    %c0_2 = arith.constant 0 : index
    %c0_3 = arith.constant 0 : index
    %5 = vector.load %arg3[%c0_2, %c0_3] : memref<64x32xf32, #tpu.memory_space<vmem>>, vector<64x32xf32>
    %6 = vector.broadcast %4 : vector<1x64xi32> to vector<8x64xi32>
    %7 = arith.cmpi eq, %3, %6 : vector<8x64xi32>
    %8 = arith.extui %7 : vector<8x64xi1> to vector<8x64xi32>
    %9 = arith.sitofp %8 : vector<8x64xi32> to vector<8x64xf32>
    %cst = arith.constant dense<0.000000e+00> : vector<8x32xf32>
    %10 = tpu.matmul %9, %5, %cst {dimension_numbers = #tpu.dot_dimension_numbers<[1], [0], [0], [1], [0, 0, 1, 1], [], []>} : vector<8x64xf32>, vector<64x32xf32>, vector<8x32xf32> -> vector<8x32xf32>
    %c0_4 = arith.constant 0 : index
    %c0_5 = arith.constant 0 : index
    %c0_6 = arith.constant 0 : index
    %11 = vector.load %arg4[%c0_4, %c0_5, %c0_6] : memref<1x8x32xf32, #tpu.memory_space<vmem>>, vector<1x8x32xf32>
    %12 = vector.shape_cast %11 : vector<1x8x32xf32> to vector<8x32xf32>
    %13 = arith.addf %12, %10 : vector<8x32xf32>
    %c0_7 = arith.constant 0 : index
    %c0_8 = arith.constant 0 : index
    %c0_9 = arith.constant 0 : index
    %14 = vector.load %arg4[%c0_7, %c0_8, %c0_9] : memref<1x8x32xf32, #tpu.memory_space<vmem>>, vector<1x8x32xf32>
    %15 = vector.shape_cast %14 : vector<1x8x32xf32> to vector<8x32xf32>
    %16 = vector.shape_cast %13 : vector<8x32xf32> to vector<1x8x32xf32>
    tpu.vector_store %arg4[%c0_7, %c0_8, %c0_9], %16 {strides = array<i32>} : memref<1x8x32xf32, #tpu.memory_space<vmem>>, vector<1x8x32xf32>,
    return
  }
  func.func @transform_0(%arg0: i32, %arg1: i32) -> (i32, i32) {
    %c1_i32 = arith.constant 1 : i32
    %0 = arith.muli %arg0, %c1_i32 : i32
    %1 = arith.addi %0, %arg1 : i32
    %c0_i32 = arith.constant 0 : i32
    %c0_i32_0 = arith.constant 0 : i32
    return %c0_i32, %1 : i32, i32
  }
  func.func @transform_1(%arg0: i32, %arg1: i32) -> (i32, i32) {
    %c1_i32 = arith.constant 1 : i32
    %0 = arith.muli %arg0, %c1_i32 : i32
    %1 = arith.addi %0, %arg1 : i32
    %c0_i32 = arith.constant 0 : i32
    %c0_i32_0 = arith.constant 0 : i32
    return %1, %c0_i32 : i32, i32
  }
  func.func @transform_2(%arg0: i32, %arg1: i32) -> (i32, i32, i32) {
    %c0_i32 = arith.constant 0 : i32
    %c0_i32_0 = arith.constant 0 : i32
    %c0_i32_1 = arith.constant 0 : i32
    return %arg0, %c0_i32, %c0_i32_0 : i32, i32, i32
  }
}

</mosaic_0001>

<bundles_post_ra>
// kernel: tpu_custom_call.1
= control target key start
LH: loop header
LB: loop body
LE: loop exit
PB: predicated region body
PF: predicated region fallthrough
CT: control target
= control target key end

     0   :  { %vm52_vm0 = vcmask 261120   ;;  %v244_v3 = vmov 0.0|0.0   ;;  %v245_v6 = vmov 0.0   ;;  %vm246_vm1 = vmmov 0   ;;  %s304_s0 = inlined_call_operand.vmem [shape: s32[1,64], index: 0, kind: input, shape index: {}]   ;;  %s305_s1 = inlined_call_operand.vmem [shape: f32[64,32], index: 1, kind: input, shape index: {}]   ;;  %s306_s2 = inlined_call_operand.hbm [shape: f32[1,8,32], index: 2, kind: output, shape index: {}]  }
   0x1   :  { %v57_v0 = vld [vmem:[%s305_s1] sm:$0xff]  ;;  %v58_v1 = vld [vmem:[%s305_s1 + $0x8] sm:$0xff]  ;;  %v59_v2 = vld [vmem:[%s305_s1 + $0x10] sm:$0xff]  ;;  %204 = vmatprep.subr.bf16.mxu0 %v244_v3  ;;  %53 = vst.msk [vmem:[#allocation2] sm:$0xff] %vm52_vm0, %v245_v6  ;;  %201 = vmatprep.mubr.msk.f32.mxu0 %vm246_vm1, %v245_v6 }
   0x2   :  { %v205_v4 = vpack.c.bf16 %v58_v1, %v57_v0  ;;  %v60_v5 = vld [vmem:[%s305_s1 + $0x18] sm:$0xff] }
   0x3   :  { %v208_v7 = vpack.c.bf16 %v60_v5, %v59_v2 }
   0x4   :  { %206 = vmatpush3.bf16.msra.mxu0 %v205_v4 }
   0x5   :  { %7 = vsyncpa [#allocation3], 0  ;;  %207 = vmatprep.subr.bf16.mxu0 %v244_v3  ;;  %v61_v8 = vld [vmem:[%s305_s1 + $0x20] sm:$0xff]  ;;  %v62_v9 = vld [vmem:[%s305_s1 + $0x28] sm:$0xff]  ;;  %v54_v10 = vlaneseq  ;;  %vm72_vm3 = vcmask 523264   ;;  %s247_s27 = smov [#allocation2]  }
   0x6   :  { %v211_v11 = vpack.c.bf16 %v62_v9, %v61_v8  ;;  %v63_v12 = vld [vmem:[%s305_s1 + $0x30] sm:$0xff]  ;;  %v64_v13 = vld [vmem:[%s305_s1 + $0x38] sm:$0xff]  ;;  %v173_v15 = vld [vmem:[%s304_s0] ss:$0 sm:$0xff]  ;;  %s156_s28 = sshll.u32 %s247_s27, 4  ;;  %s157_s28 = int_to_ptr.vmem [resolvable:$true] %s156_s28 }
   0x7   :  { %v55_v14 = vshrl.u32 %v54_v10, 7  ;;  %v214_v16 = vpack.c.bf16 %v64_v13, %v63_v12  ;;  %s220_s1 = scalar_lea.vmem %s157_s28, 128  ;;  %p225_p1 = scmp.lt.s32.totalorder %s157_s28, %s157_s28 }
   0x8   :  { %209 = vmatpush3.bf16.msra.mxu0 %v208_v7  ;;  %v146_v18 = vld [vmem:[#allocation2] sm:$0xff]  ;;  %p221_p0 = scmp.ne.s32.totalorder %s157_s28, %s220_s1  ;;  %p226_p2 = scmp.lt.s32.totalorder %s220_s1, %s220_s1 }
   0x9   :  { %210 = vmatprep.subr.bf16.mxu0 %v244_v3  ;;  %vm69_vm2 = vcmp.eq.s32.totalorder %v55_v14, %v173_v15 }
   0xa   :  { %v174_v17 = vsel %vm69_vm2, 1.0, %v245_v6  ;;  %p227_p3 = por %p226_p2, %p225_p1 }
   0xc   :  { %212 = vmatpush3.bf16.msra.mxu0 %v211_v11  ;;  %p228_p4 = pnand %p227_p3, %p221_p0 }
   0xd   :  { %213 = vmatprep.subr.bf16.mxu0 %v244_v3 }
  0x10   :  { %215 = vmatpush3.bf16.msra.mxu0 %v214_v16 }
  0x13   :  { %202 = vmatmul.mubr.msk.f32.vlgmr.msra.gmra.mrb[0].mxu0 %vm72_vm3, %v174_v17 }
  0xe6   :  { %v142_v19 = vpop.f32.mrb[0].mxu0 }
  0xe7   :  { %v147_v20 = vadd.f32 %v146_v18, %v142_v19  ;;  %v203_v21 = vpop.f32.mrb[1].mxu0 }
  0xe9   :  { %149 = vst.msk [vmem:[#allocation2] sm:$0xff] %vm52_vm0, %v147_v20 }
  0xea   :  { %231 = shalt.err (!%p228_p4)
}
  0xeb   :  { %s232_s30 = scalar_lea.hbm %s306_s2, 128 }
  0xec   :  { %p233_p5 = scmp.ne.s32.totalorder %s306_s2, %s232_s30  ;;  %p236_p6 = scmp.lt.u32.totalorder %s232_s30, %s306_s2 }
  0xee   :  { %p238_p7 = pnand %p236_p6, %p233_p5 }
  0xf0   :  { %241 = shalt.err (!%p238_p7)
}
  0xf1   :  { %159 = dma.vmem_to_hbm [thread:$0]  %s157_s28, 128, %s306_s2, [#allocation3]  }
  0xf2   :  { %242 = dma.done.wait [#allocation3], 128  }
  0xf3   :  { %243 = vsyncadd [#allocation3], 4294967168 }
  0xf4   :  { %163 = vsyncpa [#allocation3], 1 }

</bundles_post_ra>
